<compile_context>
chip_gen: v5e
topology: v5e:2x2
jax: 0.10.0
libtpu: 0.0.40
codegen_flags: <defaults>
</compile_context>

<pallas_src>
import functools
import math

import jax
import jax.numpy as jnp
from jax import lax
from jax.experimental import pallas as pl
from jax.experimental.pallas import tpu as pltpu


def _cdiv(a, b):
    return -(-a // b)


def _round_up(x, m):
    return _cdiv(x, m) * m


# ----------------------------- kernel ---------------------------------------
def _gradient_loss_kernel(x_ref, t_ref, out_ref, *, h, w, tb, n_images):
    """One batch block: x_ref / t_ref are (TB*H, W) tiles, out_ref is (1, 1, W)."""
    r = tb * h

    # Linearity of the convolution: filter the difference once.
    d = x_ref[...].astype(jnp.float32) - t_ref[...].astype(jnp.float32)

    # Horizontal pass at full width via lane rotations (shift k == -k mod W):
    #   m1[:, j] = d[:, (j+1) % W],  m2[:, j] = d[:, (j+2) % W]
    m1 = pltpu.roll(d, w - 1, axis=1)
    m2 = pltpu.roll(d, w - 2, axis=1)
    a = d + 2.0 * m1 + m2          # row-smoothing term shared by sobel_h
    b = d - m2                     # row-difference term shared by sobel_v

    # Vertical pass at full height via sublane rotations over the flattened
    # (TB*H) row axis.  Rows that wrap across an image (or block) boundary only
    # land in positions that the validity mask below zeroes out.
    a2 = pltpu.roll(a, r - 2, axis=0)       # a[(i+2) % R]
    b1 = pltpu.roll(b, r - 1, axis=0)       # b[(i+1) % R]
    b2 = pltpu.roll(b, r - 2, axis=0)       # b[(i+2) % R]
    gh = a - a2                             # sobel_h applied to d
    gv = b + 2.0 * b1 + b2                  # sobel_v applied to d
    v = jnp.abs(gh) + jnp.abs(gv)

    # Validity mask: the valid-conv output region (local row < H-2, col < W-2)
    # restricted to the real images of this (possibly ragged last) block.
    # Garbage read past the end of the batch is masked here, so no HBM-side
    # padding of the inputs is ever needed.
    blk = pl.program_id(0)
    valid_rows = jnp.minimum(n_images - blk * tb, tb) * h
    local_row = lax.broadcasted_iota(jnp.int32, (tb, h, w), 1).reshape(r, w)
    row = lax.broadcasted_iota(jnp.int32, (r, w), 0)
    col = lax.broadcasted_iota(jnp.int32, (r, w), 1)
    valid = (local_row < h - 2) & (col < w - 2) & (row < valid_rows)
    v = jnp.where(valid, v, 0.0)

    # Per-column (lane) partial sums: batch/row reduction only -- no per-step
    # cross-lane XLU reduce and no masked scalar store in the hot loop.
    out_ref[0] = jnp.sum(v, axis=0, keepdims=True)


# ----------------------------- tiling helpers --------------------------------
def _vmem_budget():
    """(block-batch sizing budget, vmem_limit_bytes), per TPU generation."""
    try:
        cap = int(pltpu.get_tpu_info().vmem_capacity_bytes)
    except Exception:
        cap = 64 * 1024 * 1024           # conservative: v7x per-TensorCore VMEM
    # ~96 MiB limit / 48 MiB budget on 128-MiB v5e/v6e; 48 / 24 MiB on 64-MiB v7x.
    limit = max(32 * 1024 * 1024,
                min(int(cap * 0.75), cap - 16 * 1024 * 1024))
    return limit // 2, limit


def _max_block_batch(h, w, itemsize, budget):
    """Images per grid step, from the lane-padded VMEM footprint."""
    wp = _round_up(w, 128)               # lane-padded row width
    # 2 inputs x 2 pipeline buffers at the input dtype, plus ~12 f32/i32-sized
    # (H, Wp) in-kernel intermediates (d, rolled copies, a, b, gh, gv, |.|,
    # iotas/mask).  Sublane padding of the 2D block is <= 7 rows total and is
    # covered by the headroom between `budget` and vmem_limit.
    per_image = 2 * 2 * h * wp * itemsize + 12 * h * wp * 4
    return max(1, budget // per_image)


def _pick_tiling(n, h, tb_cap):
    """Images per block (TB) and number of blocks.

    TB is chosen so that TB*H is a multiple of 8 (sublane-aligned BlockSpec),
    and the block count is >= 2 and preferably even so a "parallel" batch axis
    shards evenly across v7x's two TensorCores (no-op on single-TC v5e/v6e).
    """
    g = 8 // math.gcd(h, 8)              # smallest TB granule with TB*H % 8 == 0
    tb_cap = max(1, min(n, tb_cap))
    if n <= g or tb_cap < g:
        # Single full block: block dims equal the array dims, always legal.
        return n, 1
    tb_cap = (tb_cap // g) * g
    nb = _cdiv(n, tb_cap)
    if nb < 2:
        nb = 2
    if nb % 2:
        nb += 1
    tb = min(_round_up(_cdiv(n, nb), g), tb_cap)
    return tb, _cdiv(n, tb)


# ----------------------------- wrapper ---------------------------------------
def gradient_loss(inputs, targets, *, block_batch=None):
    """inputs, targets: float arrays of shape (N, 1, H, W) (NCHW, C must be 1)."""
    n, c, h, w = inputs.shape
    assert c == 1, "Sobel filter in the reference module is single-channel."
    assert targets.shape == inputs.shape
    assert h >= 3 and w >= 3, "valid 3x3 convolution needs H, W >= 3"

    # Free row-major collapse: the kernel works on (N*H, W) so only the lane
    # axis gets layout-padded.  No jnp.pad of the batch: ragged tails are
    # masked in-kernel.
    x = inputs.reshape(n * h, w)
    t = targets.reshape(n * h, w)

    budget, vmem_limit = _vmem_budget()
    itemsize = jnp.dtype(inputs.dtype).itemsize
    tb_cap = block_batch if block_batch is not None else _max_block_batch(
        h, w, itemsize, budget)
    tb, num_blocks = _pick_tiling(n, h, tb_cap)

    kernel = functools.partial(
        _gradient_loss_kernel, h=h, w=w, tb=tb, n_images=n)

    partials = pl.pallas_call(
        kernel,
        out_shape=jax.ShapeDtypeStruct((num_blocks, 1, w), jnp.float32),
        grid_spec=pltpu.PrefetchScalarGridSpec(
            num_scalar_prefetch=0,
            grid=(num_blocks,),
            # Default double buffering (depth 2) on both inputs: spare VMEM is
            # spent on a bigger batch block, not deeper pipelines.
            in_specs=[
                pl.BlockSpec((tb * h, w), lambda i: (i, 0)),
                pl.BlockSpec((tb * h, w), lambda i: (i, 0)),
            ],
            out_specs=pl.BlockSpec((1, 1, w), lambda i: (i, 0, 0)),
        ),
        compiler_params=pltpu.CompilerParams(
            # Disjoint per-block partial outputs, no carried state -> the batch
            # axis can shard across both TensorCores on v7x.
            dimension_semantics=("parallel",),
            vmem_limit_bytes=vmem_limit,
        ),
    )(x, t)

    n_pixel = n * h * w
    return (jnp.sum(partials) / jnp.float32(n_pixel)).astype(jnp.float32)


# ----------------------------- reference ------------------------------------
def _sobel_h_ref(x):
    H, W = x.shape
    top = x[0:H - 2, 0:W - 2] + 2.0 * x[0:H - 2, 1:W - 1] + x[0:H - 2, 2:W]
    bot = x[2:H, 0:W - 2] + 2.0 * x[2:H, 1:W - 1] + x[2:H, 2:W]
    return top - bot


def _sobel_v_ref(x):
    H, W = x.shape
    left = x[0:H - 2, 0:W - 2] + 2.0 * x[1:H - 1, 0:W - 2] + x[2:H, 0:W - 2]
    right = x[0:H - 2, 2:W] + 2.0 * x[1:H - 1, 2:W] + x[2:H, 2:W]
    return left - right


def _gradient_loss_ref(inputs, targets):
    """Pure-JAX mirror of the PyTorch module (filters applied separately)."""
    n, _, h, w = inputs.shape
    x = inputs.reshape(n, h, w).astype(jnp.float32)
    t = targets.reshape(n, h, w).astype(jnp.float32)
    gh = jax.vmap(_sobel_h_ref)
    gv = jax.vmap(_sobel_v_ref)
    s = jnp.sum(jnp.abs(gh(x) - gh(t)) + jnp.abs(gv(x) - gv(t)))
    return s / (n * h * w)


if __name__ == "__main__":
    key = jax.random.PRNGKey(0)
    k1, k2 = jax.random.split(key)
    # NCHW, single channel (required by the (1,1,3,3) Sobel filters).
    inputs = jax.random.normal(k1, (5, 1, 16, 128), dtype=jnp.float32)
    targets = jax.random.normal(k2, (5, 1, 16, 128), dtype=jnp.float32)

    ref = _gradient_loss_ref(inputs, targets)

    # Default (auto) tiling: ragged last block is masked in-kernel (no jnp.pad).
    loss = gradient_loss(inputs, targets)
    jax.block_until_ready(loss)
    assert jnp.allclose(loss, ref, rtol=1e-4, atol=1e-5), (loss, ref)

    # Forced small blocks: exercises the ragged-tail mask on a different grid.
    loss2 = gradient_loss(inputs, targets, block_batch=2)
    jax.block_until_ready(loss2)
    assert jnp.allclose(loss2, ref, rtol=1e-4, atol=1e-5), (loss2, ref)

    print("KERNEL_OK")
</pallas_src>

<mosaic_0001>
module attributes {stable_mosaic.version = 11 : i64} {
  func.func @_gradient_loss_kernel(%arg0: i32, %arg1: memref<48x128xf32, #tpu.memory_space<vmem>>, %arg2: memref<48x128xf32, #tpu.memory_space<vmem>>, %arg3: memref<1x1x128xf32, #tpu.memory_space<vmem>>) attributes {dimension_semantics = [#tpu.dimension_semantics<parallel>], iteration_bounds = array<i64: 2>, scalar_prefetch = 0 : i64, scratch_operands = 0 : i64, tpu.core_type = #tpu.core_type<tc>, window_params = [{transform_indices = @transform_0, window_bounds = array<i64: 48, 128>}, {transform_indices = @transform_1, window_bounds = array<i64: 48, 128>}, {transform_indices = @transform_2, window_bounds = array<i64: 1, 1, 128>}]} {
    %c0 = arith.constant 0 : index
    %c0_0 = arith.constant 0 : index
    %0 = vector.load %arg1[%c0, %c0_0] : memref<48x128xf32, #tpu.memory_space<vmem>>, vector<48x128xf32>
    %c0_1 = arith.constant 0 : index
    %c0_2 = arith.constant 0 : index
    %1 = vector.load %arg2[%c0_1, %c0_2] : memref<48x128xf32, #tpu.memory_space<vmem>>, vector<48x128xf32>
    %2 = arith.subf %0, %1 : vector<48x128xf32>
    %c127_i32 = arith.constant 127 : i32
    %3 = tpu.dynamic_rotate %2 by %c127_i32 dim 1 : vector<48x128xf32>, i32 -> vector<48x128xf32>
    %c126_i32 = arith.constant 126 : i32
    %4 = tpu.dynamic_rotate %2 by %c126_i32 dim 1 : vector<48x128xf32>, i32 -> vector<48x128xf32>
    %cst = arith.constant 2.000000e+00 : f32
    %5 = vector.broadcast %cst : f32 to vector<48x128xf32>
    %6 = arith.mulf %5, %3 : vector<48x128xf32>
    %7 = arith.addf %2, %6 : vector<48x128xf32>
    %8 = arith.addf %7, %4 : vector<48x128xf32>
    %9 = arith.subf %2, %4 : vector<48x128xf32>
    %c46_i32 = arith.constant 46 : i32
    %10 = tpu.dynamic_rotate %8 by %c46_i32 dim 0 : vector<48x128xf32>, i32 -> vector<48x128xf32>
    %c47_i32 = arith.constant 47 : i32
    %11 = tpu.dynamic_rotate %9 by %c47_i32 dim 0 : vector<48x128xf32>, i32 -> vector<48x128xf32>
    %c46_i32_3 = arith.constant 46 : i32
    %12 = tpu.dynamic_rotate %9 by %c46_i32_3 dim 0 : vector<48x128xf32>, i32 -> vector<48x128xf32>
    %13 = arith.subf %8, %10 : vector<48x128xf32>
    %cst_4 = arith.constant 2.000000e+00 : f32
    %14 = vector.broadcast %cst_4 : f32 to vector<48x128xf32>
    %15 = arith.mulf %14, %11 : vector<48x128xf32>
    %16 = arith.addf %9, %15 : vector<48x128xf32>
    %17 = arith.addf %16, %12 : vector<48x128xf32>
    %18 = math.absf %13 : vector<48x128xf32>
    %19 = math.absf %17 : vector<48x128xf32>
    %20 = arith.addf %18, %19 : vector<48x128xf32>
    %c3_i32 = arith.constant 3 : i32
    %21 = arith.muli %arg0, %c3_i32 : i32
    %c5_i32 = arith.constant 5 : i32
    %22 = arith.subi %c5_i32, %21 : i32
    %c3_i32_5 = arith.constant 3 : i32
    %23 = arith.minsi %22, %c3_i32_5 : i32
    %c16_i32 = arith.constant 16 : i32
    %24 = arith.muli %23, %c16_i32 : i32
    %25 = tpu.iota {dimensions = array<i32: 1>} : vector<3x16x128xi32>
    %26 = vector.shape_cast %25 : vector<3x16x128xi32> to vector<48x128xi32>
    %27 = tpu.iota {dimensions = array<i32: 0>} : vector<48x128xi32>
    %28 = tpu.iota {dimensions = array<i32: 1>} : vector<48x128xi32>
    %c14_i32 = arith.constant 14 : i32
    %29 = vector.broadcast %c14_i32 : i32 to vector<48x128xi32>
    %30 = arith.cmpi slt, %26, %29 : vector<48x128xi32>
    %c126_i32_6 = arith.constant 126 : i32
    %31 = vector.broadcast %c126_i32_6 : i32 to vector<48x128xi32>
    %32 = arith.cmpi slt, %28, %31 : vector<48x128xi32>
    %33 = arith.andi %30, %32 : vector<48x128xi1>
    %34 = vector.broadcast %24 : i32 to vector<48x128xi32>
    %35 = arith.cmpi slt, %27, %34 : vector<48x128xi32>
    %36 = arith.andi %33, %35 : vector<48x128xi1>
    %cst_7 = arith.constant 0.000000e+00 : f32
    %37 = vector.broadcast %cst_7 : f32 to vector<48x128xf32>
    %38 = arith.select %36, %20, %37 : vector<48x128xi1>, vector<48x128xf32>
    %cst_8 = arith.constant dense<0.000000e+00> : vector<128xf32>
    %39 = vector.multi_reduction <add>, %38, %cst_8 [0] : vector<48x128xf32> to vector<128xf32>
    %40 = vector.shape_cast %39 : vector<128xf32> to vector<1x128xf32>
    %c0_9 = arith.constant 0 : index
    %c0_10 = arith.constant 0 : index
    %c0_11 = arith.constant 0 : index
    %41 = vector.load %arg3[%c0_9, %c0_10, %c0_11] : memref<1x1x128xf32, #tpu.memory_space<vmem>>, vector<1x1x128xf32>
    %42 = vector.shape_cast %41 : vector<1x1x128xf32> to vector<1x128xf32>
    %43 = vector.shape_cast %40 : vector<1x128xf32> to vector<1x1x128xf32>
    tpu.vector_store %arg3[%c0_9, %c0_10, %c0_11], %43 {strides = array<i32>} : memref<1x1x128xf32, #tpu.memory_space<vmem>>, vector<1x1x128xf32>,
    return
  }
  func.func @transform_0(%arg0: i32) -> (i32, i32) {
    %c0_i32 = arith.constant 0 : i32
    %c0_i32_0 = arith.constant 0 : i32
    return %arg0, %c0_i32 : i32, i32
  }
  func.func @transform_1(%arg0: i32) -> (i32, i32) {
    %c0_i32 = arith.constant 0 : i32
    %c0_i32_0 = arith.constant 0 : i32
    return %arg0, %c0_i32 : i32, i32
  }
  func.func @transform_2(%arg0: i32) -> (i32, i32, i32) {
    %c0_i32 = arith.constant 0 : i32
    %c0_i32_0 = arith.constant 0 : i32
    %c0_i32_1 = arith.constant 0 : i32
    return %arg0, %c0_i32, %c0_i32_0 : i32, i32, i32
  }
}

</mosaic_0001>

<bundles_post_ra>
// kernel: tpu_custom_call.1
= control target key start
LH: loop header
LB: loop body
LE: loop exit
PB: predicated region body
PF: predicated region fallthrough
CT: control target
= control target key end

     0   :  { %7 = vsyncpa [#allocation3], 0  ;;  %s1160_s0 = inlined_call_operand.hbm [shape: f32[80,128], index: 0, kind: input, shape index: {}]   ;;  %s1161_s1 = inlined_call_operand.hbm [shape: f32[80,128], index: 1, kind: input, shape index: {}]   ;;  %s1162_s2 = inlined_call_operand.hbm [shape: f32[2,1,128], index: 2, kind: output, shape index: {}]  }
   0x1   :  { %9 = vsyncpa [#allocation3 + $0x1], 0 }
   0x2   :  { %10 = vsyncpa [#allocation6], 0 }
   0x3   :  { %12 = vsyncpa [#allocation6 + $0x1], 0 }
   0x4   :  { %13 = vsyncpa [#allocation4], 0 }
   0x5   :  { %15 = vsyncpa [#allocation4 + $0x1], 0  ;;  %s769_s9 = smov 0   ;;  %s771_s10 = smov 0  }
   0x6   :  { %s773_s11 = smov 0   ;;  %s775_s12 = smov 0  }
   0x7 LB: > { %s790_s13 = sadd.s32 4294967295, %s744_s12   ;;  %s527_s14 = sadd.s32 4294967294, %s744_s12   ;;  %s744_s12 = sphi %s775_s12, %s1183_s12   ;;  %s740_s11 = sphi %s773_s11, %s1182_s11   ;;  %s736_s10 = sphi %s771_s10, %s1181_s10   ;;  %s732_s9 = sphi %s769_s9, %s1180_s9  }
   0x8   : > { %s794_s15 = sadd.s32 1, %s744_s12   ;;  %s28_s16 = sadd.s32 1, %s740_s11 }
   0x9   : > { %s25_s17 = ssub.s32 %s744_s12, %s794_s15  ;;  %p35_p0 = scmp.ne.s32.totalorder %s740_s11, %s736_s10 }
   0xa   : > { %p26_p1 = scmp.eq.s32.totalorder %s25_s17, 0  ;;  %p36_p2 = scmp.eq.s32.totalorder %s744_s12, 0 }
   0xb   : > { %p41_p3 = scmp.ne.s32.totalorder %s736_s10, %s732_s9  ;;  %p42_p4 = scmp.eq.s32.totalorder %s790_s13, 0 }
   0xc   : > { %s806_s18 = scalar_select %p26_p1, %s740_s11, %s28_s16  }
   0xd   : > { %p808_p5 = por %p36_p2, %p35_p0  ;;  %p812_p6 = por %p42_p4, %p41_p3 }
   0xe   : > { %p91_p7 = scmp.eq.s32.totalorder %s790_s13, 1  ;;  %p97_p8 = scmp.eq.s32.totalorder %s527_s14, 1 }
   0xf   : > { %p1163_p11 = scmp.ge.s32.totalorder %s744_s12, 2 }
  0x10   : > { %p817_p9 = por %p91_p7, %p35_p0  ;;  %p821_p10 = por %p97_p8, %p41_p3 }
  0x11   : > { %113 = sbr.rel (%p1163_p11) target bundleno = 98 (0x62), region = 16 }
  0x12   : > { %s1167_s22 = scalar_select %p821_p10, 1, 0 }
  0x16   : > { %116 = sbr.rel (!%p808_p5) target bundleno = 60 (0x3c), region = 20  ;;  %s117_s23 = sand.u32 (%p808_p5), 1, %s740_s11  }
  0x17   : > { %s122_s24 = smul.u32 (%p808_p5), 6, %s744_s12  ;;  %s835_s30 = scalar_lea.sflag (%p808_p5), [#allocation3], %s117_s23 }
  0x18   : > { %s546_s25 = smul.u32 (%p808_p5), 48, %s117_s23 }
  0x19   : > { %s123_s26 = ssub.s32 (%p808_p5), 10, %s122_s24 }
  0x1a   : > { %p124_p12 = scmp.lt.s32.totalorder (%p808_p5), %s123_s26, 6  ;;  %s121_s3 = scalar_lea.vmem (%p808_p5), [#allocation2], %s546_s25 }
  0x1c   : > { %s1185_s26 = smov (!%p124_p12, %s123_s26), 6 }
  0x1d   : > { %s530_s27 = sshll.u32 %s1185_s26, 3 }
  0x1e   : > { %s127_s28 = ssub.s32 48, %s530_s27 }
  0x1f   : > { %s128_s29 = sshll.u32 %s127_s28, 4 }
  0x20   : > { %129 = vsyncadd %s835_s30, %s128_s29  ;;  %p838_p13 = scmp.ne.s32.totalorder %s530_s27, 0  ;;  %s544_s5 = smul.u32 48, %s744_s12 }
  0x21   : > { %s843_s6 = sshll.u32 %s121_s3, 4  ;;  %s534_s7 = sshll.u32 %s1185_s26, 7  ;;  %s137_s6 = int_to_ptr.vmem [resolvable:$true] %s843_s6 }
  0x22   : > { %s132_s16 = scalar_lea.hbm %s1160_s0, %s544_s5  ;;  %s598_s24 = sshrl.u32 %s534_s7, 4 }
  0x23   : > { %s134_s17 = sshll.u32 %s132_s16, 4  ;;  %s607_s29 = scalar_lea.hbm %s1160_s0, 80  ;;  %s850_s17 = int_to_ptr.hbm [resolvable:$true] %s134_s17 }
  0x24   : > { %s596_s23 = sshra.s32 %s850_s17, 4  ;;  %s597_s23 = int_to_ptr.hbm [resolvable:$true] %s596_s23 }
  0x25   : > { %s603_s25 = scalar_lea.hbm %s597_s23, %s598_s24  ;;  %p608_p3 = scmp.lt.s32.totalorder %s597_s23, %s1160_s0 }
  0x26   : > { %p604_p0 = scmp.ne.s32.totalorder %s597_s23, %s603_s25  ;;  %p609_p4 = scmp.lt.s32.totalorder %s607_s29, %s603_s25 }
  0x28   : > { %p605_p1 = pnand %p604_p0, %p838_p13  ;;  %p610_p7 = por %p609_p4, %p608_p3 }
  0x2a   : > { %p606_p2 = pneg %p605_p1 }
  0x2c   : > { %p611_p8 = pnand %p610_p7, %p606_p2 }
  0x2e   : > { %614 = shalt.err (!%p611_p8)
}
  0x2f   : > { %s615_s8 = sshra.s32 %s137_s6, 4  ;;  %s746_s16 = smov [#allocation2]   ;;  %s616_s8 = int_to_ptr.vmem [resolvable:$true] %s615_s8 }
  0x30   : > { %s622_s14 = scalar_lea.vmem %s616_s8, %s598_s24  ;;  %s626_s27 = scalar_lea.vmem %s746_s16, 96 }
  0x31   : > { %p623_p12 = scmp.ne.s32.totalorder %s616_s8, %s622_s14  ;;  %p628_p11 = scmp.lt.s32.totalorder %s626_s27, %s622_s14 }
  0x33   : > { %p624_p0 = pnand %p623_p12, %p838_p13 }
  0x35   : > { %p625_p1 = pneg %p624_p0 }
  0x37   : > { %p630_p10 = pnand %p628_p11, %p625_p1 }
  0x39   : > { %633 = shalt.err (!%p630_p10)
}
  0x3a   : > { %s747_s23 = smov 128   ;;  %s748_s25 = smov 8  }
  0x3b   : > { %142 = dma.hbm_to_vmem [thread:$0]  (%p838_p13), %s850_s17, %s534_s7, %s137_s6, %s835_s30, %s747_s23, %s747_s23, %s748_s25  }
  0x3c PF: > { %145 = sbr.rel (!%p808_p5) target bundleno = 98 (0x62), region = 24  ;;  %s146_s24 = sand.u32 (%p808_p5), 1, %s740_s11  }
  0x3d   : > { %s151_s28 = smul.u32 (%p808_p5), 6, %s744_s12  ;;  %s882_s14 = scalar_lea.sflag (%p808_p5), [#allocation6], %s146_s24 }
  0x3e   : > { %s547_s29 = smul.u32 (%p808_p5), 48, %s146_s24 }
  0x3f   : > { %s152_s3 = ssub.s32 (%p808_p5), 10, %s151_s28 }
  0x40   : > { %p153_p10 = scmp.lt.s32.totalorder (%p808_p5), %s152_s3, 6  ;;  %s150_s26 = scalar_lea.vmem (%p808_p5), [#allocation5], %s547_s29 }
  0x42   : > { %s1187_s3 = smov (!%p153_p10, %s152_s3), 6 }
  0x43   : > { %s535_s5 = sshll.u32 %s1187_s3, 3 }
  0x44   : > { %s156_s8 = ssub.s32 48, %s535_s5 }
  0x45   : > { %s157_s4 = sshll.u32 %s156_s8, 4 }
  0x46   : > { %158 = vsyncadd %s882_s14, %s157_s4  ;;  %p885_p5 = scmp.ne.s32.totalorder %s535_s5, 0  ;;  %s545_s30 = smul.u32 48, %s744_s12 }
  0x47   : > { %s890_s6 = sshll.u32 %s150_s26, 4  ;;  %s539_s7 = sshll.u32 %s1187_s3, 7  ;;  %s166_s6 = int_to_ptr.vmem [resolvable:$true] %s890_s6 }
  0x48   : > { %s161_s27 = scalar_lea.hbm %s1161_s1, %s545_s30  ;;  %s637_s24 = sshrl.u32 %s539_s7, 4 }
  0x49   : > { %s163_s23 = sshll.u32 %s161_s27, 4  ;;  %s646_s8 = scalar_lea.hbm %s1161_s1, 80  ;;  %s897_s23 = int_to_ptr.hbm [resolvable:$true] %s163_s23 }
  0x4a   : > { %s635_s25 = sshra.s32 %s897_s23, 4  ;;  %s636_s25 = int_to_ptr.hbm [resolvable:$true] %s635_s25 }
  0x4b   : > { %s642_s28 = scalar_lea.hbm %s636_s25, %s637_s24  ;;  %p647_p3 = scmp.lt.s32.totalorder %s636_s25, %s1161_s1 }
  0x4c   : > { %p643_p11 = scmp.ne.s32.totalorder %s636_s25, %s642_s28  ;;  %p648_p4 = scmp.lt.s32.totalorder %s646_s8, %s642_s28 }
  0x4e   : > { %p644_p13 = pnand %p643_p11, %p885_p5  ;;  %p649_p7 = por %p648_p4, %p647_p3 }
  0x50   : > { %p645_p2 = pneg %p644_p13 }
  0x52   : > { %p650_p8 = pnand %p649_p7, %p645_p2 }
  0x54   : > { %653 = shalt.err (!%p650_p8)
}
  0x55   : > { %s654_s30 = sshra.s32 %s166_s6, 4  ;;  %s749_s16 = smov [#allocation5]   ;;  %s655_s30 = int_to_ptr.vmem [resolvable:$true] %s654_s30 }
  0x56   : > { %s661_s17 = scalar_lea.vmem %s655_s30, %s637_s24  ;;  %s665_s27 = scalar_lea.vmem %s749_s16, 96 }
  0x57   : > { %p662_p12 = scmp.ne.s32.totalorder %s655_s30, %s661_s17  ;;  %p667_p10 = scmp.lt.s32.totalorder %s665_s27, %s661_s17 }
  0x59   : > { %p663_p0 = pnand %p662_p12, %p885_p5 }
  0x5b   : > { %p664_p1 = pneg %p663_p0 }
  0x5d   : > { %p669_p11 = pnand %p667_p10, %p664_p1 }
  0x5f   : > { %672 = shalt.err (!%p669_p11)
}
  0x60   : > { %s750_s25 = smov 128   ;;  %s751_s28 = smov 8  }
  0x61   : > { %171 = dma.hbm_to_vmem [thread:$0]  (%p885_p5), %s897_s23, %s539_s7, %s166_s6, %s882_s14, %s750_s25, %s750_s25, %s751_s28  }
  0x62 PF: > { %p540_p13 = scmp.ge.s32.totalorder %s744_s12, 1  ;;  %p173_p2 = scmp.lt.s32.totalorder %s744_s12, 3 }
  0x64   : > { %p174_p3 = pnand %p540_p13, %p173_p2 }
  0x65   : > { %s925_s24 = sand.u32 (!%p174_p3), 1, %s736_s10  }
  0x66   : > { %177 = sbr.rel (%p174_p3) target bundleno = 290 (0x122), region = 28  ;;  %s180_s5 = scalar_lea.sflag (!%p174_p3), [#allocation3], %s925_s24 }
  0x67   : > { %s548_s29 = smul.u32 (!%p174_p3), 48, %s925_s24 }
  0x69   : > { %s929_s19 = scalar_lea.vmem (!%p174_p3), [#allocation2], %s548_s29 }
  0x6b   : > { %719 = dma.done.wait (%p812_p6), %s180_s5, 768  }
  0x6c   : > { %721 = vsyncadd (%p812_p6), %s180_s5, 4294966528  ;;  %s190_s3 = scalar_lea.sflag [#allocation6], %s925_s24  ;;  %s936_s14 = scalar_lea.vmem [#allocation5], %s548_s29 }
  0x6d   : > { %723 = dma.done.wait (%p812_p6), %s190_s3, 768  }
  0x6e   : > { %725 = vsyncadd (%p812_p6), %s190_s3, 4294966528  ;;  %v231_v0 = vld [vmem:[%s929_s19 + $0x10] sm:$0xff]  ;;  %v229_v2 = vld [vmem:[%s929_s19] sm:$0xff]  ;;  %s752_s20 = smov 127   ;;  %s753_s6 = smov 126   ;;  %v301_v20 = vlaneseq }
  0x6f   : > { %v237_v1 = vld [vmem:[%s936_s14 + $0x10] sm:$0xff]  ;;  %v235_v4 = vld [vmem:[%s936_s14] sm:$0xff]  ;;  %v230_v5 = vld [vmem:[%s929_s19 + $0x8] sm:$0xff]  ;;  %s377_s7 = smul.u32 3, %s790_s13  ;;  %s434_s30 = scalar_lea.hbm %s1162_s2, %s790_s13 }
  0x70   : > { %v243_v3 = vsub.f32 %v231_v0, %v237_v1  ;;  %v236_v6 = vld [vmem:[%s936_s14 + $0x8] sm:$0xff]  ;;  %v241_v7 = vsub.f32 %v229_v2, %v235_v4  ;;  %v232_v9 = vld [vmem:[%s929_s19 + $0x18] sm:$0xff]  ;;  %v233_v11 = vld [vmem:[%s929_s19 + $0x20] sm:$0xff]  ;;  %v971_v23 = vshrl.u32 %v301_v20, 7  ;;  %v1000_v53 = vand.u32 127, %v301_v20  ;;  %s218_s17 = scalar_lea.vmem [#allocation7], %s925_s24 }
  0x71   : > { %v242_v8 = vsub.f32 %v230_v5, %v236_v6  ;;  %v238_v10 = vld [vmem:[%s936_s14 + $0x18] sm:$0xff]  ;;  %v239_v12 = vld [vmem:[%s936_s14 + $0x20] sm:$0xff]  ;;  %v234_v15 = vld [vmem:[%s929_s19 + $0x28] sm:$0xff]  ;;  %s378_s23 = ssub.s32 5, %s377_s7  ;;  %s436_s16 = sshll.u32 %s218_s17, 4  ;;  %s437_s16 = int_to_ptr.vmem [resolvable:$true] %s436_s16 }
  0x72   : > { %251 = vrot.lane.b32.xlu1 %v243_v3, %s752_s20  ;;  %247 = vrot.lane.b32.xlu0 %v241_v7, %s752_s20  ;;  %v952_v13 = vsub.f32 %v232_v9, %v238_v10  ;;  %v954_v14 = vsub.f32 %v233_v11, %v239_v12  ;;  %v240_v16 = vld [vmem:[%s936_s14 + $0x28] sm:$0xff]  ;;  %vm316_vm0 = vcmp.lt.s32.totalorder %v971_v23, 7  ;;  %p379_p6 = scmp.lt.s32.totalorder %s378_s23, 3  ;;  %vm303_vm1 = vcmp.lt.s32.totalorder %v971_v23, 6  ;;  %s438_s27 = sshll.u32 %s434_s30, 4  ;;  %s439_s27 = int_to_ptr.hbm [resolvable:$true] %s438_s27 }
  0x73   : > { %261 = vrot.lane.b32.xlu2 %v242_v8, %s753_s6  ;;  %v961_v17 = vsub.f32 %v234_v15, %v240_v16  ;;  %v998_v52 = vadd.s32 8, %v971_v23  ;;  %vm391_vm3 = vcmp.lt.s32.totalorder %v1000_v53, 126  ;;  %v383_v5 = vadd.s32 16, %v971_v23  ;;  %s426_s25 = scalar_lea.sflag [#allocation4], %s925_s24  ;;  %s688_s28 = sshra.s32 %s439_s27, 4  ;;  %s689_s28 = int_to_ptr.hbm [resolvable:$true] %s688_s28 }
  0x74   : > { %s1189_s23 = smov (!%p379_p6, %s378_s23), 3  ;;  %s690_s29 = scalar_lea.hbm %s689_s28, 1 }
  0x75   : > { %s541_s8 = sshll.u32 %s1189_s23, 4  ;;  %vm390_vm2 = vcmp.lt.s32.totalorder %v998_v52, 14  ;;  %p691_p5 = scmp.ne.s32.totalorder %s689_s28, %s690_s29 }
  0x76   : > { %v1002_v56 = vstv %s541_s8  ;;  %vm1055_vm7 = vmand %vm390_vm2, %vm391_vm3  ;;  %s694_s13 = scalar_lea.hbm %s1162_s2, 2  ;;  %p695_p8 = scmp.lt.s32.totalorder %s689_s28, %s1162_s2 }
  0x77   : > { %vm395_vm4 = vcmp.lt.s32.totalorder %v971_v23, %v1002_v56  ;;  %vm396_vm5 = vcmp.lt.s32.totalorder %v998_v52, %v1002_v56  ;;  %vm397_vm6 = vcmp.lt.s32.totalorder %v383_v5, %v1002_v56  ;;  %p692_p4 = pnand %p691_p5, %p817_p9  ;;  %p696_p12 = scmp.lt.s32.totalorder %s694_s13, %s690_s29 }
  0x78   : > { %vm1075_vm8 = vmand %vm391_vm3, %vm395_vm4 }
  0x79   : > { %vm1084_vm9 = vmand %vm1055_vm7, %vm396_vm5  ;;  %p693_p7 = pneg %p692_p4  ;;  %p697_p0 = por %p696_p12, %p695_p8 }
  0x7a   : > { %259 = vrot.lane.b32.xlu1 %v241_v7, %s753_s6  ;;  %249 = vrot.lane.b32.xlu0 %v242_v8, %s752_s20  ;;  %vm1098_vm10 = vmand %vm391_vm3, %vm397_vm6 }
  0x7b   : > { %263 = vrot.lane.b32.xlu2 %v243_v3, %s753_s6  ;;  %p698_p1 = pnand %p697_p0, %p693_p7 }
  0x82   : > { %265 = vrot.lane.b32.xlu1 %v952_v13, %s753_s6  ;;  %253 = vrot.lane.b32.xlu0 %v952_v13, %s752_s20 }
  0x83   : > { %255 = vrot.lane.b32.xlu2 %v954_v14, %s752_s20 }
  0x8a   : > { %257 = vrot.lane.b32.xlu1 %v961_v17, %s752_s20  ;;  %267 = vrot.lane.b32.xlu0 %v954_v14, %s753_s6 }
  0x8b   : > { %269 = vrot.lane.b32.xlu2 %v961_v17, %s753_s6 }
  0xcd   : > { %v262_v18 = vpop.permute.xlu2 %261 }
  0xce   : > { %v966_v21 = vsub.f32 %v242_v8, %v262_v18 }
  0xd0   : > { %v311_v27 = vrot.slane %v966_v21, 1  ;;  %v324_v37 = vrot.slane %v966_v21, 2 }
  0xd5   : > { %v264_v19 = vpop.permute.xlu2 %263 }
  0xd6   : > { %v968_v22 = vsub.f32 %v243_v3, %v264_v19 }
  0xd8   : > { %v312_v28 = vrot.slane %v968_v22, 1  ;;  %v325_v38 = vrot.slane %v968_v22, 2 }
  0xda   : > { %v320_v29 = vsel %vm316_vm0, %v311_v27, %v312_v28  ;;  %v332_v48 = vsel %vm303_vm1, %v324_v37, %v325_v38 }
  0xdb   : > { %v342_v35 = vmul.f32 2.0, %v320_v29 }
  0xdd   : > { %v256_v25 = vpop.permute.xlu2 %255  ;;  %v348_v45 = vadd.f32 %v342_v35, %v966_v21 }
  0xde   : > { %v275_v55 = vmul.f32 2.0, %v256_v25 }
  0xdf   : > { %v354_v62 = vadd.f32 %v348_v45, %v332_v48  ;;  %v385_v48 = vadd.s32 32, %v971_v23 }
  0xe1   : > { %v366_v16 = vand.u32 2147483647, %v354_v62  ;;  %vm399_vm12 = vcmp.lt.s32.totalorder %v385_v48, %v1002_v56 }
  0xe2   : > { %vm405_vm15 = vmand %vm391_vm3, %vm399_vm12 }
  0xe4   : > { %v252_v24 = vpop.permute.xlu1 %251  ;;  %v248_v26 = vpop.permute.xlu0 %247 }
  0xe5   : > { %v273_v30 = vmul.f32 2.0, %v252_v24  ;;  %v271_v32 = vmul.f32 2.0, %v248_v26  ;;  %v982_v40 = vpop.permute.xlu2 %269 }
  0xe6   : > { %v991_v46 = vsub.f32 %v961_v17, %v982_v40 }
  0xe7   : > { %v279_v39 = vadd.f32 %v273_v30, %v243_v3  ;;  %v277_v43 = vadd.f32 %v271_v32, %v241_v7 }
  0xe8   : > { %v315_v60 = vrot.slane %v991_v46, 1 }
  0xe9   : > { %v285_v49 = vadd.f32 %v279_v39, %v264_v19 }
  0xeb   : > { %v297_v0 = vrot.slane %v285_v49, 2 }
  0xec   : > { %v260_v31 = vpop.permute.xlu1 %259  ;;  %v250_v34 = vpop.permute.xlu0 %249 }
  0xed   : > { %v978_v33 = vsub.f32 %v241_v7, %v260_v31  ;;  %v272_v36 = vmul.f32 2.0, %v250_v34  ;;  %v995_v50 = vadd.f32 %v277_v43, %v260_v31 }
  0xef   : > { %v310_v41 = vrot.slane %v978_v33, 1  ;;  %v278_v42 = vadd.f32 %v272_v36, %v242_v8  ;;  %v323_v61 = vrot.slane %v978_v33, 2  ;;  %v295_v1 = vrot.slane %v995_v50, 2 }
  0xf1   : > { %v321_v44 = vsel %vm316_vm0, %v310_v41, %v311_v27  ;;  %v284_v47 = vadd.f32 %v278_v42, %v262_v18  ;;  %v333_v10 = vsel %vm303_vm1, %v323_v61, %v324_v37  ;;  %v281_v18 = vadd.f32 %v275_v55, %v954_v14 }
  0xf2   : > { %v341_v51 = vmul.f32 2.0, %v321_v44  ;;  %v1042_v27 = vadd.s32 40, %v971_v23  ;;  %v328_v37 = vrot.slane %v991_v46, 2 }
  0xf3   : > { %v296_v57 = vrot.slane %v284_v47, 2 }
  0xf4   : > { %v266_v54 = vpop.permute.xlu1 %265  ;;  %v254_v59 = vpop.permute.xlu0 %253  ;;  %v347_v2 = vadd.f32 %v341_v51, %v978_v33  ;;  %vm400_vm14 = vcmp.lt.s32.totalorder %v1042_v27, %v1002_v56 }
  0xf5   : > { %v1005_v58 = vsub.f32 %v952_v13, %v266_v54  ;;  %v274_v63 = vmul.f32 2.0, %v254_v59  ;;  %v307_v6 = vsel %vm303_vm1, %v296_v57, %v297_v0  ;;  %v308_v7 = vsel %vm303_vm1, %v295_v1, %v296_v57 }
  0xf6   : > { %v353_v15 = vadd.f32 %v347_v2, %v333_v10  ;;  %v335_v19 = vsub.f32 %v995_v50, %v308_v7  ;;  %v336_v20 = vsub.f32 %v284_v47, %v307_v6  ;;  %v334_v57 = vsel %vm303_vm1, %v328_v37, %v323_v61 }
  0xf7   : > { %v313_v3 = vrot.slane %v1005_v58, 1  ;;  %v280_v4 = vadd.f32 %v274_v63, %v952_v13  ;;  %v326_v9 = vrot.slane %v1005_v58, 2  ;;  %v322_v13 = vsel %vm316_vm0, %v315_v60, %v310_v41 }
  0xf8   : > { %v346_v30 = vmul.f32 2.0, %v322_v13  ;;  %v360_v39 = vand.u32 2147483647, %v336_v20 }
  0xf9   : > { %v319_v8 = vsel %vm316_vm0, %v312_v28, %v313_v3  ;;  %v1031_v12 = vadd.f32 %v280_v4, %v266_v54  ;;  %v331_v26 = vsel %vm303_vm1, %v325_v38, %v326_v9  ;;  %v359_v38 = vand.u32 2147483647, %v335_v19 }
  0xfa   : > { %v343_v11 = vmul.f32 2.0, %v319_v8  ;;  %v372_v62 = vadd.f32 %v366_v16, %v360_v39 }
  0xfb   : > { %v298_v24 = vrot.slane %v1031_v12, 2 }
  0xfc   : > { %v349_v21 = vadd.f32 %v343_v11, %v968_v22  ;;  %v258_v25 = vpop.permute.xlu1 %257  ;;  %v268_v29 = vpop.permute.xlu0 %267  ;;  %v365_v22 = vand.u32 2147483647, %v353_v15  ;;  %v408_v11 = vsel %vm1084_vm9, %v372_v62, 0.0 }
  0xfd   : > { %v276_v28 = vmul.f32 2.0, %v258_v25  ;;  %v306_v32 = vsel %vm303_vm1, %v297_v0, %v298_v24  ;;  %v287_v33 = vadd.f32 %v281_v18, %v268_v29  ;;  %v293_v36 = vsub.f32 %v954_v14, %v268_v29 }
  0xfe   : > { %v355_v31 = vadd.f32 %v349_v21, %v331_v26  ;;  %v337_v34 = vsub.f32 %v285_v49, %v306_v32  ;;  %v352_v14 = vadd.f32 %v346_v30, %v991_v46  ;;  %v371_v59 = vadd.f32 %v365_v22, %v359_v38 }
  0xff   : > { %v282_v35 = vadd.f32 %v276_v28, %v961_v17  ;;  %v299_v41 = vrot.slane %v287_v33, 2  ;;  %v314_v45 = vrot.slane %v293_v36, 1  ;;  %v384_v17 = vadd.s32 24, %v971_v23 }
 0x100   : > { %v367_v42 = vand.u32 2147483647, %v355_v31  ;;  %v361_v43 = vand.u32 2147483647, %v337_v34  ;;  %v327_v49 = vrot.slane %v293_v36, 2  ;;  %v358_v8 = vadd.f32 %v352_v14, %v334_v57 }
 0x101   : > { %v288_v44 = vadd.f32 %v282_v35, %v982_v40  ;;  %v305_v40 = vsel %vm303_vm1, %v298_v24, %v299_v41  ;;  %v317_v54 = vsel %vm316_vm0, %v314_v45, %v315_v60  ;;  %v318_v55 = vsel %vm316_vm0, %v313_v3, %v314_v45  ;;  %vm406_vm0 = vmand %vm1055_vm7, %vm400_vm14 }
 0x102   : > { %v344_v63 = vmul.f32 2.0, %v318_v55  ;;  %v373_v61 = vadd.f32 %v367_v42, %v361_v43  ;;  %v345_v3 = vmul.f32 2.0, %v317_v54  ;;  %v338_v6 = vsub.f32 %v1031_v12, %v305_v40 }
 0x103   : > { %v300_v51 = vrot.slane %v288_v44, 2  ;;  %vm398_vm11 = vcmp.lt.s32.totalorder %v384_v17, %v1002_v56  ;;  %v407_v5 = vsel %vm1075_vm8, %v371_v59, 0.0  ;;  %v329_v13 = vsel %vm303_vm1, %v327_v49, %v328_v37 }
 0x104   : > { %v350_v50 = vadd.f32 %v344_v63, %v1005_v58  ;;  %v351_v10 = vadd.f32 %v345_v3, %v293_v36  ;;  %v409_v58 = vsel %vm1098_vm10, %v373_v61, 0.0  ;;  %v413_v20 = vadd.f32 %v408_v11, %v407_v5  ;;  %vm404_vm13 = vmand %vm1055_vm7, %vm398_vm11 }
 0x105   : > { %v309_v0 = vsel %vm303_vm1, %v300_v51, %v295_v1  ;;  %v304_v2 = vsel %vm303_vm1, %v299_v41, %v300_v51  ;;  %v330_v1 = vsel %vm303_vm1, %v326_v9, %v327_v49  ;;  %v362_v9 = vand.u32 2147483647, %v338_v6 }
 0x106   : > { %v340_v4 = vsub.f32 %v288_v44, %v309_v0  ;;  %v339_v7 = vsub.f32 %v287_v33, %v304_v2  ;;  %v356_v12 = vadd.f32 %v350_v50, %v330_v1  ;;  %v357_v15 = vadd.f32 %v351_v10, %v329_v13 }
 0x107   : > { %v370_v23 = vand.u32 2147483647, %v358_v8  ;;  %v414_v25 = vadd.f32 %v413_v20, %v409_v58 }
 0x108   : > { %v363_v16 = vand.u32 2147483647, %v339_v7  ;;  %v364_v18 = vand.u32 2147483647, %v340_v4  ;;  %v368_v19 = vand.u32 2147483647, %v356_v12 }
 0x109   : > { %v369_v21 = vand.u32 2147483647, %v357_v15 }
 0x10a   : > { %v374_v24 = vadd.f32 %v368_v19, %v362_v9  ;;  %v376_v28 = vadd.f32 %v370_v23, %v364_v18 }
 0x10b   : > { %v375_v26 = vadd.f32 %v369_v21, %v363_v16 }
 0x10c   : > { %v410_v29 = vsel %vm404_vm13, %v374_v24, 0.0  ;;  %v412_v33 = vsel %vm406_vm0, %v376_v28, 0.0 }
 0x10d   : > { %v415_v30 = vadd.f32 %v414_v25, %v410_v29  ;;  %v411_v31 = vsel %vm405_vm15, %v375_v26, 0.0 }
 0x10f   : > { %v416_v32 = vadd.f32 %v415_v30, %v411_v31 }
 0x111   : > { %v417_v22 = vadd.f32 %v416_v32, %v412_v33 }
 0x113   : > { %v418_v56 = vrot.slane %v417_v22, 4 }
 0x115   : > { %v419_v27 = vadd.f32 %v418_v56, %v417_v22 }
 0x117   : > { %v420_v34 = vrot.slane %v419_v27, 2 }
 0x119   : > { %v421_v53 = vadd.f32 %v420_v34, %v419_v27 }
 0x11b   : > { %v422_v35 = vrot.slane %v421_v53, 1 }
 0x11d   : > { %v423_v36 = vadd.f32 %v422_v35, %v421_v53 }
 0x11f   : > { %424 = vst [vmem:[%s218_s17] sm:$0x1] %v423_v36 }
 0x120   : > { %701 = shalt.err (!%p698_p1)
}
 0x121   : > { %551 = dma.vmem_to_hbm [thread:$0]  (%p817_p9), %s437_s16, 16, %s439_s27, %s426_s25  }
 0x122 PF: > { %s450_s24 = sand.u32 1, %s732_s9   ;;  %p1178_p10 = scmp.ne.s32.totalorder %s1167_s22, 0 }
 0x123   : > { %p1179_p11 = scmp.ge.s32.totalorder %s744_s12, 2  ;;  %s451_s20 = scalar_lea.sflag [#allocation4], %s450_s24 }
 0x125   : > { %p554_p13 = pnand %p1179_p11, %p1178_p10 }
 0x127   : > { %p555_p2 = pneg %p554_p13 }
 0x129   : > { %727 = dma.done.wait (%p555_p2), %s451_s20, 16  }
 0x12a   : > { %729 = vsyncadd (%p555_p2), %s451_s20, 4294967280  ;;  %p18_p3 = scmp.ge.s32.totalorder %s794_s15, 4   ;;  %s1180_s9 = smov %s736_s10 }
 0x12b   : > { %s1181_s10 = smov %s740_s11  ;;  %s1182_s11 = smov %s806_s18 }
 0x12c   : > { %s1183_s12 = smov %s794_s15  ;;  %20 = sbr.rel (!%p18_p3) target bundleno = 7 (0x7), region = 86 }
 0x131   :  { %456 = vsyncpa [#allocation3], 1 }
 0x132   :  { %458 = vsyncpa [#allocation3 + $0x1], 1 }
 0x133   :  { %459 = vsyncpa [#allocation6], 1 }
 0x134   :  { %461 = vsyncpa [#allocation6 + $0x1], 1 }
 0x135   :  { %462 = vsyncpa [#allocation4], 1 }
 0x136   :  { %464 = vsyncpa [#allocation4 + $0x1], 1 }

</bundles_post_ra>
